<compile_context>
chip_gen: v7x
topology: tpu7x:2x2x1
jax: 0.10.0
libtpu: 0.0.40
codegen_flags: <defaults>
</compile_context>

<pallas_src>
import functools
import math

import jax
import jax.numpy as jnp
from jax.experimental import pallas as pl
from jax.experimental.pallas import tpu as pltpu


def _round_up(x, m):
    return (x + m - 1) // m * m


def _cdiv(a, b):
    return (a + b - 1) // b


# sublane tile per element byte width (f32 -> 8, bf16 -> 16, int8/fp8 -> 32)
_SUBLANE = {4: 8, 2: 16, 1: 32}


# ----------------------------- kernel bodies --------------------------------

def _gen_kernel_single_k(x_ref, w_ref, s_ref, b_ref, o_ref):
    # H fits in a single K tile: no accumulator scratch, fused epilogue.
    acc = jnp.dot(x_ref[...], w_ref[...], preferred_element_type=jnp.float32)
    o_ref[...] = (acc * s_ref[...] + b_ref[...]).astype(o_ref.dtype)


def _gen_kernel_multi_k(x_ref, w_ref, s_ref, b_ref, o_ref, acc_ref):
    k = pl.program_id(2)
    prod = jnp.dot(x_ref[...], w_ref[...], preferred_element_type=jnp.float32)

    @pl.when(k == 0)
    def _():
        acc_ref[...] = prod            # direct write: no zero-init pass

    @pl.when(k != 0)
    def _():
        acc_ref[...] += prod

    @pl.when(k == pl.num_programs(2) - 1)
    def _():
        o_ref[...] = (acc_ref[...] * s_ref[...] + b_ref[...]).astype(o_ref.dtype)


# ------------------------- tile / VMEM selection -----------------------------

def _vmem_budget_bytes():
    cap = 64 << 20
    try:
        info = pltpu.get_tpu_info()
        cap = int(getattr(info, "vmem_capacity_bytes", cap) or cap)
    except Exception:
        pass
    if cap >= (100 << 20):             # v5e / v6e: 128 MiB physical VMEM
        return 100 << 20
    # v7x-class (64 MiB): leave headroom for Mosaic internal scratch/semaphores
    return max(min(cap - (20 << 20), 44 << 20), 16 << 20)


# Ordered largest-first: HBM traffic ~ M*V*H*(1/tm + 1/tn); tk only costs VMEM.
_TILE_CANDIDATES = (
    (1024, 4096, 1024),
    (1024, 2048, 1024),
    (512, 2048, 1024),
    (512, 2048, 512),
    (512, 1024, 512),
    (256, 1024, 512),
    (256, 512, 512),
    (128, 512, 256),
    (128, 256, 256),
    (64, 256, 128),
    (32, 128, 128),
    (16, 128, 128),
    (8, 128, 128),
)


def _vmem_need(tm, tn, tk, nk, in_itemsize, out_itemsize):
    return (2 * (tm * tk + tk * tn) * in_itemsize    # double-buffered x, W^T
            + 2 * 2 * tn * 4                         # scale + bias tiles (f32)
            + 2 * tm * tn * out_itemsize             # double-buffered output
            + (tm * tn * 4 if nk > 1 else 0))        # f32 accumulator scratch


def _pick_tiles(m_al, v_al, h_al, sub, in_itemsize, out_itemsize, budget):
    pick = None
    for ctm, ctn, ctk in _TILE_CANDIDATES:
        tm = min(_round_up(min(ctm, m_al), sub), m_al)
        tn = min(ctn, v_al)
        tk = min(ctk, h_al)
        nk = _cdiv(h_al, tk)
        pick = (tm, tn, tk)
        if _vmem_need(tm, tn, tk, nk, in_itemsize, out_itemsize) <= budget:
            return pick
    return pick


# ------------------------------- public API ----------------------------------

def generator_logits(x2d, weight=None, bias=None, *, fix_norm=False,
                     compute_dtype=None, out_dtype=None, weight_t=None,
                     tm=None, tn=None, tk=None):
    """x2d: (M, H); weight: (V, H) (nn.Linear layout); bias: (V,) -> (M, V).

    weight_t: optional pre-transposed weight (H, V).  Pass it from model setup
    to avoid a per-call transpose of the (possibly multi-GB) vocab matrix.
    """
    M, H = x2d.shape
    if weight_t is None:
        assert weight is not None, "need weight or weight_t"
        V, H_w = weight.shape
        # TODO(synk): callers should hoist this transpose to model setup.
        weight_t = weight.T                                   # (H, V)
    else:
        H_w, V = weight_t.shape
    assert H == H_w, "hidden size mismatch"

    out_dtype = out_dtype or x2d.dtype

    # fix_norm: per-row inverse L2 norm folded into the epilogue (no
    # normalized copy of W is ever materialized).
    if fix_norm:
        if weight is not None:
            norm = jnp.sqrt(jnp.sum(weight.astype(jnp.float32) ** 2, axis=-1))
        else:
            norm = jnp.sqrt(jnp.sum(weight_t.astype(jnp.float32) ** 2, axis=0))
        scale = 1.0 / jnp.maximum(norm, 1e-12)                # (V,)
    else:
        scale = jnp.ones((V,), jnp.float32)

    if compute_dtype is not None:
        x2d = x2d.astype(compute_dtype)
        weight_t = weight_t.astype(compute_dtype)

    in_itemsize = jnp.dtype(x2d.dtype).itemsize
    out_itemsize = jnp.dtype(out_dtype).itemsize
    sub = _SUBLANE.get(in_itemsize, 8)

    m_al = _round_up(M, sub)
    v_al = _round_up(V, 128)
    h_al = _round_up(H, 128)

    budget = _vmem_budget_bytes()
    a_tm, a_tn, a_tk = _pick_tiles(m_al, v_al, h_al, sub,
                                   in_itemsize, out_itemsize, budget)
    tm = a_tm if tm is None else min(_round_up(tm, sub), m_al)
    tn = a_tn if tn is None else min(_round_up(tn, 128), v_al)
    tk = a_tk if tk is None else min(_round_up(tk, 128), h_al)

    nv, nm, nk = _cdiv(v_al, tn), _cdiv(m_al, tm), _cdiv(h_al, tk)

    # Megacore (v7x): keep at least two blocks on a parallel axis when possible.
    if nv == 1 and nm == 1:
        if v_al >= 256:
            tn = _round_up(_cdiv(v_al, 2), 128)
            nv = _cdiv(v_al, tn)
        elif m_al >= 2 * sub:
            tm = _round_up(_cdiv(m_al, 2), sub)
            nm = _cdiv(m_al, tm)

    M_pad, V_pad, H_pad = nm * tm, nv * tn, nk * tk

    # ---- pad operands (zero padding does not change the matmul result) ----
    if (M_pad, H_pad) != (M, H):
        x2d = jnp.pad(x2d, ((0, M_pad - M), (0, H_pad - H)))
    if (H_pad, V_pad) != (H, V):
        weight_t = jnp.pad(weight_t, ((0, H_pad - H), (0, V_pad - V)))
    scale2d = scale.reshape(1, V).astype(jnp.float32)
    bias2d = bias.reshape(1, V).astype(jnp.float32)
    if V_pad != V:
        scale2d = jnp.pad(scale2d, ((0, 0), (0, V_pad - V)))
        bias2d = jnp.pad(bias2d, ((0, 0), (0, V_pad - V)))

    need = _vmem_need(tm, tn, tk, nk, in_itemsize, out_itemsize)
    vmem_limit = int(min(max(need * 5 // 4 + (2 << 20), 32 << 20), budget))

    # When nk == 1 the W tile index is constant across the row-tile axis, so
    # Pallas re-uses it instead of re-fetching -> W streamed once.
    w_reads = 1 if nk == 1 else nm
    cost = pl.CostEstimate(
        flops=2 * M_pad * H_pad * V_pad,
        transcendentals=0,
        bytes_accessed=(nv * M_pad * H_pad * in_itemsize      # x re-read nv times
                        + w_reads * H_pad * V_pad * in_itemsize
                        + M_pad * V_pad * out_itemsize
                        + 2 * V_pad * 4),
    )

    if nk == 1:
        kernel = _gen_kernel_single_k
        grid = (nv, nm)
        in_specs = [
            pl.BlockSpec((tm, tk), lambda v, m: (m, 0)),      # x
            pl.BlockSpec((tk, tn), lambda v, m: (0, v)),      # W^T
            pl.BlockSpec((1, tn), lambda v, m: (0, v)),       # scale
            pl.BlockSpec((1, tn), lambda v, m: (0, v)),       # bias
        ]
        out_spec = pl.BlockSpec((tm, tn), lambda v, m: (m, v))
        scratch = []
        dims = ("parallel", "parallel")
    else:
        kernel = _gen_kernel_multi_k
        grid = (nv, nm, nk)
        in_specs = [
            pl.BlockSpec((tm, tk), lambda v, m, k: (m, k)),   # x
            pl.BlockSpec((tk, tn), lambda v, m, k: (k, v)),   # W^T
            pl.BlockSpec((1, tn), lambda v, m, k: (0, v)),    # scale
            pl.BlockSpec((1, tn), lambda v, m, k: (0, v)),    # bias
        ]
        out_spec = pl.BlockSpec((tm, tn), lambda v, m, k: (m, v))
        scratch = [pltpu.VMEM((tm, tn), jnp.float32)]
        dims = ("parallel", "parallel", "arbitrary")

    out = pl.pallas_call(
        kernel,
        out_shape=jax.ShapeDtypeStruct((M_pad, V_pad), out_dtype),
        grid_spec=pltpu.PrefetchScalarGridSpec(
            num_scalar_prefetch=0,
            grid=grid,
            in_specs=in_specs,
            out_specs=out_spec,
            scratch_shapes=scratch,
        ),
        compiler_params=pltpu.CompilerParams(
            dimension_semantics=dims,
            vmem_limit_bytes=vmem_limit,
        ),
        cost_estimate=cost,
    )(x2d, weight_t, scale2d, bias2d)

    if (M_pad, V_pad) != (M, V):
        out = out[:M, :V]
    return out


def generator_forward(output_dicts, weight, bias, fix_norm=False, **kwargs):
    """Mirrors Generator.forward: reads 'hidden', writes 'logits' into the dict."""
    hidden = output_dicts["hidden"]                 # (seq, batch, H)
    _ = output_dicts["target_mask"]                 # read but unused, as in reference
    S, B, H = hidden.shape
    V = weight.shape[0] if weight is not None else kwargs["weight_t"].shape[1]
    x2d = hidden.reshape(S * B, H)
    logits2d = generator_logits(x2d, weight, bias, fix_norm=fix_norm, **kwargs)
    output_dicts["logits"] = logits2d.reshape(S, B, V)
    return output_dicts


if __name__ == "__main__":
    # small shapes: seq=8, batch=2, hidden=32, vocab(output_size)=64
    S, B, H, V = 8, 2, 32, 64

    key = jax.random.PRNGKey(0)
    k_x, k_w, k_x2, k_w2 = jax.random.split(key, 4)

    hidden = jax.random.normal(k_x, (S, B, H), dtype=jnp.float32)
    target_mask = jnp.ones((S, B), dtype=jnp.float32)

    # deterministic init matching the module: uniform(-stdv, stdv), zero bias
    stdv = 1.0 / math.sqrt(H)
    weight = jax.random.uniform(k_w, (V, H), dtype=jnp.float32,
                                minval=-stdv, maxval=stdv)
    bias = jnp.zeros((V,), dtype=jnp.float32)

    x2d = hidden.reshape(S * B, H)
    ref = x2d @ weight.T + bias

    # --- f32 path ---
    out = generator_forward({"hidden": hidden, "target_mask": target_mask},
                            weight, bias, fix_norm=False)
    logits = jax.block_until_ready(out["logits"])
    assert logits.shape == (S, B, V)
    assert jnp.allclose(logits.reshape(S * B, V), ref, atol=1e-4), \
        "mismatch vs reference (f32)"

    # --- fix_norm path (normalization folded into the epilogue) ---
    out_fn = generator_forward({"hidden": hidden, "target_mask": target_mask},
                               weight, bias, fix_norm=True)
    logits_fn = jax.block_until_ready(out_fn["logits"])
    w_norm = weight / jnp.maximum(
        jnp.sqrt(jnp.sum(weight * weight, axis=-1, keepdims=True)), 1e-12)
    ref_fn = x2d @ w_norm.T + bias
    assert jnp.allclose(logits_fn.reshape(S * B, V), ref_fn, atol=1e-4), \
        "mismatch vs reference (fix_norm)"

    # --- bf16-operand fast path (f32 accumulation) ---
    out_bf = generator_forward({"hidden": hidden, "target_mask": target_mask},
                               weight, bias, fix_norm=False,
                               compute_dtype=jnp.bfloat16)
    logits_bf = jax.block_until_ready(out_bf["logits"]).astype(jnp.float32)
    assert jnp.allclose(logits_bf.reshape(S * B, V), ref, rtol=2e-2, atol=2e-2), \
        "mismatch vs reference (bf16 operands)"

    # --- multi-K accumulator path (tk override forces nk > 1) ---
    H2 = 256
    hidden2 = jax.random.normal(k_x2, (S, B, H2), dtype=jnp.float32)
    weight2 = jax.random.uniform(k_w2, (V, H2), dtype=jnp.float32,
                                 minval=-1.0 / math.sqrt(H2),
                                 maxval=1.0 / math.sqrt(H2))
    out2 = generator_forward({"hidden": hidden2, "target_mask": target_mask},
                             weight2, bias, fix_norm=False, tk=128)
    logits2 = jax.block_until_ready(out2["logits"])
    ref2 = hidden2.reshape(S * B, H2) @ weight2.T + bias
    assert jnp.allclose(logits2.reshape(S * B, V), ref2, atol=1e-4), \
        "mismatch vs reference (multi-K)"

    print("KERNEL_OK")
</pallas_src>

<mosaic_0001>
module attributes {stable_mosaic.version = 11 : i64} {
  func.func @_gen_kernel_single_k(%arg0: i32, %arg1: i32, %arg2: memref<8x128xf32, #tpu.memory_space<vmem>>, %arg3: memref<128x128xf32, #tpu.memory_space<vmem>>, %arg4: memref<1x128xf32, #tpu.memory_space<vmem>>, %arg5: memref<1x128xf32, #tpu.memory_space<vmem>>, %arg6: memref<8x128xf32, #tpu.memory_space<vmem>>) attributes {dimension_semantics = [#tpu.dimension_semantics<parallel>, #tpu.dimension_semantics<parallel>], iteration_bounds = array<i64: 1, 2>, scalar_prefetch = 0 : i64, scratch_operands = 0 : i64, tpu.core_type = #tpu.core_type<tc>, window_params = [{transform_indices = @transform_0, window_bounds = array<i64: 8, 128>}, {transform_indices = @transform_1, window_bounds = array<i64: 128, 128>}, {transform_indices = @transform_2, window_bounds = array<i64: 1, 128>}, {transform_indices = @transform_3, window_bounds = array<i64: 1, 128>}, {transform_indices = @transform_4, window_bounds = array<i64: 8, 128>}]} {
    %c0 = arith.constant 0 : index
    %c0_0 = arith.constant 0 : index
    %0 = vector.load %arg2[%c0, %c0_0] : memref<8x128xf32, #tpu.memory_space<vmem>>, vector<8x128xf32>
    %c0_1 = arith.constant 0 : index
    %c0_2 = arith.constant 0 : index
    %1 = vector.load %arg3[%c0_1, %c0_2] : memref<128x128xf32, #tpu.memory_space<vmem>>, vector<128x128xf32>
    %cst = arith.constant dense<0.000000e+00> : vector<8x128xf32>
    %2 = tpu.matmul %0, %1, %cst {dimension_numbers = #tpu.dot_dimension_numbers<[1], [0], [0], [1], [0, 0, 1, 1], [], []>} : vector<8x128xf32>, vector<128x128xf32>, vector<8x128xf32> -> vector<8x128xf32>
    %c0_3 = arith.constant 0 : index
    %c0_4 = arith.constant 0 : index
    %3 = vector.load %arg4[%c0_3, %c0_4] : memref<1x128xf32, #tpu.memory_space<vmem>>, vector<1x128xf32>
    %4 = vector.broadcast %3 : vector<1x128xf32> to vector<8x128xf32>
    %5 = arith.mulf %2, %4 : vector<8x128xf32>
    %c0_5 = arith.constant 0 : index
    %c0_6 = arith.constant 0 : index
    %6 = vector.load %arg5[%c0_5, %c0_6] : memref<1x128xf32, #tpu.memory_space<vmem>>, vector<1x128xf32>
    %7 = vector.broadcast %6 : vector<1x128xf32> to vector<8x128xf32>
    %8 = arith.addf %5, %7 : vector<8x128xf32>
    %c0_7 = arith.constant 0 : index
    %c0_8 = arith.constant 0 : index
    %9 = vector.load %arg6[%c0_7, %c0_8] : memref<8x128xf32, #tpu.memory_space<vmem>>, vector<8x128xf32>
    tpu.vector_store %arg6[%c0_7, %c0_8], %8 {strides = array<i32>} : memref<8x128xf32, #tpu.memory_space<vmem>>, vector<8x128xf32>,
    return
  }
  func.func @transform_0(%arg0: i32, %arg1: i32) -> (i32, i32) {
    %c0_i32 = arith.constant 0 : i32
    %c0_i32_0 = arith.constant 0 : i32
    return %arg1, %c0_i32 : i32, i32
  }
  func.func @transform_1(%arg0: i32, %arg1: i32) -> (i32, i32) {
    %c0_i32 = arith.constant 0 : i32
    %c0_i32_0 = arith.constant 0 : i32
    return %c0_i32, %arg0 : i32, i32
  }
  func.func @transform_2(%arg0: i32, %arg1: i32) -> (i32, i32) {
    %c0_i32 = arith.constant 0 : i32
    %c0_i32_0 = arith.constant 0 : i32
    return %c0_i32, %arg0 : i32, i32
  }
  func.func @transform_3(%arg0: i32, %arg1: i32) -> (i32, i32) {
    %c0_i32 = arith.constant 0 : i32
    %c0_i32_0 = arith.constant 0 : i32
    return %c0_i32, %arg0 : i32, i32
  }
  func.func @transform_4(%arg0: i32, %arg1: i32) -> (i32, i32) {
    %c0_i32 = arith.constant 0 : i32
    return %arg1, %arg0 : i32, i32
  }
}

</mosaic_0001>

<bundles_post_ra>
// kernel: tpu_custom_call.1
= control target key start
LH: loop header
LB: loop body
LE: loop exit
PB: predicated region body
PF: predicated region fallthrough
CT: control target
= control target key end

     0   :  { %9 = vsyncpa [#allocation3], 0  ;;  %s1090_s0 = inlined_call_operand.hbm [shape: f32[16,128], index: 0, kind: input, shape index: {}]   ;;  %s1091_s1 = inlined_call_operand.hbm [shape: f32[128,128], index: 1, kind: input, shape index: {}]   ;;  %s1092_s2 = inlined_call_operand.vmem [shape: f32[1,128], index: 2, kind: input, shape index: {}]   ;;  %s1093_s3 = inlined_call_operand.vmem [shape: f32[1,128], index: 3, kind: input, shape index: {}]   ;;  %s1094_s4 = inlined_call_operand.hbm [shape: f32[16,128], index: 4, kind: output, shape index: {}]  }
   0x1   :  { %11 = vsyncpa [#allocation3 + $0x1], 0 }
   0x2   :  { %12 = vsyncpa [#allocation6], 0 }
   0x3   :  { %13 = vsyncpa [#allocation4], 0 }
   0x4   :  { %15 = vsyncpa [#allocation4 + $0x1], 0  ;;  %s863_s15 = smov 0   ;;  %s865_s16 = smov 0  }
   0x5   :  { %s867_s17 = smov 0   ;;  %s869_s18 = smov 0  }
   0x6   :  { %s871_s19 = smov 0   ;;  %s873_s20 = smov 0  }
   0x7 LB: > { %s511_s21 = sadd.s32 4294967295, %s828_s20   ;;  %s512_s22 = sadd.s32 4294967294, %s828_s20   ;;  %s828_s20 = sphi %s873_s20, %s21_s20   ;;  %s824_s19 = sphi %s871_s19, %s1118_s19   ;;  %s820_s18 = sphi %s869_s18, %s1117_s18   ;;  %s816_s17 = sphi %s867_s17, %s1116_s17   ;;  %s812_s16 = sphi %s865_s16, %s1115_s16   ;;  %s808_s15 = sphi %s863_s15, %s1114_s15  }
   0x8   : > { %p53_p0 = scmp.ne.s32.totalorder %s812_s16, %s808_s15  ;;  %p897_p1 = scmp.eq.s32.totalorder %s511_s21, 0 }
   0x9   : > { %p901_p2 = scmp.eq.s32.totalorder %s511_s21, 1  ;;  %p163_p3 = scmp.eq.s32.totalorder %s512_s22, 1 }
   0xa   : > { %s1099_s23 = scalar_select %p897_p1, 1, 0 }
   0xb   : > { %s1100_s24 = scalar_select %p901_p2, 1, 0 }
   0xc   : > { %p907_p4 = por %p897_p1, %p53_p0  ;;  %p513_p5 = scmp.ge.s32.totalorder %s828_s20, 1 }
   0xd   : > { %p912_p6 = por %p163_p3, %p53_p0  ;;  %p170_p7 = scmp.lt.s32.totalorder %s828_s20, 3 }
   0xe   : > { %s1101_s25 = scalar_select %p907_p4, 1, 0 }
   0xf   : > { %s1102_s26 = scalar_select %p912_p6, 1, 0 }
  0x10   : > { %p917_p8 = pnand %p513_p5, %p170_p7  ;;  %s830_s28 = smov [#allocation5]  }
  0x11   : > { %s184_s29 = sshll.u32 %s830_s28, 4  ;;  %s30_s5 = sadd.s32 1, %s824_s19  ;;  %s185_s29 = int_to_ptr.vmem [resolvable:$true] %s184_s29 }
  0x12   : > { %s1103_s27 = scalar_select %p917_p8, 1, 0 }
  0x13   : > { %p614_p9 = pneg %p917_p8  ;;  %s684_s8 = scalar_lea.hbm %s1091_s1, 2048 }
  0x14   : > { %p685_p12 = scmp.ne.s32.totalorder %s1091_s1, %s684_s8  ;;  %p691_p5 = scmp.lt.u32.totalorder %s684_s8, %s1091_s1 }
  0x15   : > { %p926_p11 = pnand %p614_p9, %p897_p1 }
  0x17   : > { %p686_p13 = pneg %p926_p11 }
  0x19   : > { %p687_p0 = pnand %p686_p13, %p685_p12 }
  0x1b   : > { %p688_p3 = pneg %p687_p0 }
  0x1d   : > { %p693_p7 = pnand %p691_p5, %p688_p3 }
  0x1f   : > { %696 = shalt.err (!%p693_p7)
}
  0x20   : > { %s697_s13 = scalar_lea.vmem %s185_s29, 2048  ;;  %p705_p1 = scmp.lt.s32.totalorder %s185_s29, %s185_s29 }
  0x21   : > { %p698_p9 = scmp.ne.s32.totalorder %s185_s29, %s697_s13  ;;  %p706_p4 = scmp.lt.s32.totalorder %s697_s13, %s697_s13 }
  0x23   : > { %p700_p10 = pnand %p698_p9, %p686_p13  ;;  %p707_p8 = por %p706_p4, %p705_p1 }
  0x25   : > { %p701_p6 = pneg %p700_p10 }
  0x27   : > { %p708_p2 = pnand %p707_p8, %p701_p6 }
  0x29   : > { %711 = shalt.err (!%p708_p2)
}
  0x2a   : > { %s831_s14 = smov 128   ;;  %s832_s21 = smov 8  }
  0x2b   : > { %617 = dma.hbm_to_vmem [thread:$0]  (!%p926_p11), %s1091_s1, 2048, %s185_s29, [#allocation6], %s831_s14, %s831_s14, %s832_s21  }
  0x2c   : > { %p31_p1 = scmp.ge.s32.totalorder %s30_s5, 2  ;;  %s40_s6 = sadd.s32 1, %s816_s17 }
  0x2d   : > { %p47_p2 = scmp.ne.s32.totalorder %s816_s17, %s812_s16  ;;  %p48_p4 = scmp.eq.s32.totalorder %s828_s20, 0 }
  0x2e   : > { %s1120_s5 = smov (%p31_p1, %s30_s5), 0  ;;  %p1106_p8 = scmp.ne.s32.totalorder %s1100_s24, 0 }
  0x2f   : > { %p953_p6 = por %p48_p4, %p47_p2  ;;  %s37_s30 = ssub.s32 %s824_s19, %s1120_s5 }
  0x30   : > { %p959_p10 = por %p1106_p8, %p47_p2  ;;  %p627_p12 = scmp.lt.s32.totalorder %s828_s20, 2 }
  0x31   : > { %p38_p11 = scmp.eq.s32.totalorder %s37_s30, 0  ;;  %s210_s29 = sand.u32 1, %s816_s17  }
  0x32   : > { %s518_s9 = sshll.u32 %s210_s29, 3  ;;  %s519_s11 = sshll.u32 %s824_s19, 7 }
  0x33   : > { %s968_s10 = scalar_select %p38_p11, %s816_s17, %s40_s6  }
  0x34   : > { %s974_s14 = scalar_lea.hbm %s1090_s0, %s519_s11  ;;  %s214_s24 = scalar_lea.vmem [#allocation2], %s518_s9 }
  0x35   : > { %s221_s21 = sshll.u32 %s214_s24, 4  ;;  %p980_p13 = pnand %p627_p12, %p953_p6  ;;  %s976_s21 = int_to_ptr.vmem [resolvable:$true] %s221_s21 }
  0x36   : > { %s211_s28 = scalar_lea.sflag [#allocation3], %s210_s29  ;;  %s712_s6 = scalar_lea.hbm %s974_s14, 128 }
  0x37   : > { %p713_p0 = scmp.ne.s32.totalorder %s974_s14, %s712_s6  ;;  %p714_p3 = pneg %p980_p13 }
  0x38   : > { %s717_s11 = scalar_lea.hbm %s1090_s0, 256  ;;  %p718_p9 = scmp.lt.u32.totalorder %s974_s14, %s1090_s0 }
  0x39   : > { %p715_p5 = pnand %p714_p3, %p713_p0  ;;  %p719_p1 = scmp.lt.u32.totalorder %s717_s11, %s712_s6 }
  0x3a   : > { %p721_p4 = scmp.lt.u32.totalorder %s712_s6, %s974_s14 }
  0x3b   : > { %p716_p7 = pneg %p715_p5  ;;  %p720_p2 = por %p719_p1, %p718_p9 }
  0x3d   : > { %p722_p6 = por %p721_p4, %p720_p2 }
  0x3f   : > { %p723_p8 = pnand %p722_p6, %p716_p7 }
  0x41   : > { %726 = shalt.err (!%p723_p8)
}
  0x42   : > { %s727_s29 = scalar_lea.vmem %s976_s21, 128  ;;  %s833_s13 = smov [#allocation2]  }
  0x43   : > { %p728_p12 = scmp.ne.s32.totalorder %s976_s21, %s727_s29  ;;  %s732_s24 = sshll.u32 %s833_s13, 4  ;;  %s733_s24 = int_to_ptr.vmem [resolvable:$false] %s732_s24 }
  0x44   : > { %s734_s30 = scalar_lea.vmem %s733_s24, 256  ;;  %p735_p5 = scmp.lt.s32.totalorder %s976_s21, %s733_s24 }
  0x45   : > { %p730_p11 = pnand %p728_p12, %p714_p3  ;;  %p736_p9 = scmp.lt.s32.totalorder %s734_s30, %s727_s29 }
  0x47   : > { %p731_p0 = pneg %p730_p11  ;;  %p737_p1 = por %p736_p9, %p735_p5 }
  0x49   : > { %p738_p2 = pnand %p737_p1, %p731_p0 }
  0x4b   : > { %741 = shalt.err (!%p738_p2)
}
  0x4c   : > { %621 = dma.hbm_to_vmem [thread:$0]  (!%p980_p13), %s974_s14, 128, %s976_s21, %s211_s28  }
  0x4d   : > { %p1109_p7 = scmp.ne.s32.totalorder %s1103_s27, 0 }
  0x4e   : > { %s1012_s6 = sand.u32 (!%p1109_p7), 1, %s812_s16   ;;  %p1110_p3 = scmp.ne.s32.totalorder (!%p1109_p7), %s1101_s25, 0 }
  0x4f   : > { %230 = sbr.rel (%p1109_p7) target bundleno = 355 (0x163), region = 36  ;;  %s521_s9 = sshll.u32 (!%p1109_p7), %s1012_s6, 3 }
  0x50   : > { %s233_s11 = scalar_lea.sflag (!%p1109_p7), [#allocation3], %s1012_s6  ;;  %s1018_s7 = scalar_lea.vmem (!%p1109_p7), [#allocation2], %s521_s9 }
  0x56   : > { %795 = dma.done.wait (%p1110_p3), %s233_s11, 128  }
  0x57   : > { %797 = vsyncadd (%p1110_p3), %s233_s11, 4294967168  ;;  %p1111_p13 = scmp.ne.s32.totalorder %s1099_s23, 0 }
  0x59   : > { %799 = dma.done.wait (%p1111_p13), [#allocation6], 2048  }
  0x5a   : > { %801 = vsyncadd (%p1111_p13), [#allocation6], 4294965248  ;;  %v834_v0 = vmov 0.0|0.0   ;;  %vm835_vm0 = vmmov 0   ;;  %v836_v1 = vmov 0.0   ;;  %v278_v2 = vld [vmem:[#allocation5] sm:$0xff] }
  0x5b   : > { %582 = vmatprep.subr.bf16.mxu0 %v834_v0  ;;  %579 = vmatprep.mubr.msk.f32.mxu0 %vm835_vm0, %v836_v1  ;;  %v279_v3 = vld [vmem:[#allocation5 + $0x8] sm:$0xff]  ;;  %v280_v4 = vld [vmem:[#allocation5 + $0x10] sm:$0xff]  ;;  %v281_v6 = vld [vmem:[#allocation5 + $0x18] sm:$0xff]  ;;  %s527_s21 = sshll.u32 %s820_s18, 7  ;;  %s270_s22 = scalar_lea.vmem [#allocation7], %s521_s9 }
  0x5c   : > { %v583_v5 = vpack.c.bf16 %v279_v3, %v278_v2  ;;  %v586_v7 = vpack.c.bf16 %v281_v6, %v280_v4  ;;  %v282_v8 = vld [vmem:[#allocation5 + $0x20] sm:$0xff]  ;;  %v283_v9 = vld [vmem:[#allocation5 + $0x28] sm:$0xff]  ;;  %v284_v11 = vld [vmem:[#allocation5 + $0x30] sm:$0xff]  ;;  %s396_s28 = sshll.u32 %s270_s22, 4  ;;  %s1041_s13 = scalar_lea.hbm %s1094_s4, %s527_s21  ;;  %s1043_s28 = int_to_ptr.vmem [resolvable:$true] %s396_s28 }
  0x5d   : > { %v589_v10 = vpack.c.bf16 %v283_v9, %v282_v8  ;;  %v285_v12 = vld [vmem:[#allocation5 + $0x38] sm:$0xff]  ;;  %v286_v14 = vld [vmem:[#allocation5 + $0x40] sm:$0xff]  ;;  %v287_v15 = vld [vmem:[#allocation5 + $0x48] sm:$0xff]  ;;  %s382_s24 = scalar_lea.sflag [#allocation4], %s1012_s6  ;;  %s742_s30 = scalar_lea.vmem %s1043_s28, 128 }
  0x5e   : > { %584 = vmatpush3.bf16.msra.mxu0 %v583_v5  ;;  %v592_v13 = vpack.c.bf16 %v285_v12, %v284_v11  ;;  %v595_v16 = vpack.c.bf16 %v287_v15, %v286_v14  ;;  %v288_v17 = vld [vmem:[#allocation5 + $0x50] sm:$0xff]  ;;  %v289_v18 = vld [vmem:[#allocation5 + $0x58] sm:$0xff]  ;;  %v290_v20 = vld [vmem:[#allocation5 + $0x60] sm:$0xff]  ;;  %p743_p4 = scmp.ne.s32.totalorder %s1043_s28, %s742_s30  ;;  %s837_s18 = smov [#allocation7]  }
  0x5f   : > { %585 = vmatprep.subr.bf16.mxu0 %v834_v0  ;;  %v598_v19 = vpack.c.bf16 %v289_v18, %v288_v17  ;;  %v291_v21 = vld [vmem:[#allocation5 + $0x68] sm:$0xff]  ;;  %v292_v23 = vld [vmem:[#allocation5 + $0x70] sm:$0xff]  ;;  %v293_v24 = vld [vmem:[#allocation5 + $0x78] sm:$0xff]  ;;  %s746_s9 = sshll.u32 %s837_s18, 4  ;;  %s747_s9 = int_to_ptr.vmem [resolvable:$false] %s746_s9 }
  0x60   : > { %v601_v22 = vpack.c.bf16 %v291_v21, %v290_v20  ;;  %v604_v25 = vpack.c.bf16 %v293_v24, %v292_v23  ;;  %v277_v26 = vld [vmem:[%s1018_s7] sm:$0xff]  ;;  %p744_p6 = pnand %p743_p4, %p959_p10  ;;  %s748_s11 = scalar_lea.vmem %s747_s9, 256 }
  0x61   : > { %v524_v27 = vld [vmem:[%s1092_s2] ss:$0 sm:$0xff]  ;;  %p749_p12 = scmp.lt.s32.totalorder %s1043_s28, %s747_s9  ;;  %p750_p11 = scmp.lt.s32.totalorder %s748_s11, %s742_s30 }
  0x62   : > { %587 = vmatpush3.bf16.msra.mxu0 %v586_v7  ;;  %v525_v29 = vld [vmem:[%s1093_s3] ss:$0 sm:$0xff]  ;;  %p745_p8 = pneg %p744_p6 }
  0x63   : > { %588 = vmatprep.subr.bf16.mxu0 %v834_v0  ;;  %p751_p0 = por %p750_p11, %p749_p12 }
  0x65   : > { %p752_p5 = pnand %p751_p0, %p745_p8 }
  0x66   : > { %590 = vmatpush3.bf16.msra.mxu0 %v589_v10 }
  0x67   : > { %591 = vmatprep.subr.bf16.mxu0 %v834_v0 }
  0x6a   : > { %593 = vmatpush3.bf16.msra.mxu0 %v592_v13 }
  0x6b   : > { %594 = vmatprep.subr.bf16.mxu0 %v834_v0 }
  0x6e   : > { %596 = vmatpush3.bf16.msra.mxu0 %v595_v16 }
  0x6f   : > { %597 = vmatprep.subr.bf16.mxu0 %v834_v0 }
  0x72   : > { %599 = vmatpush3.bf16.msra.mxu0 %v598_v19 }
  0x73   : > { %600 = vmatprep.subr.bf16.mxu0 %v834_v0 }
  0x76   : > { %602 = vmatpush3.bf16.msra.mxu0 %v601_v22 }
  0x77   : > { %603 = vmatprep.subr.bf16.mxu0 %v834_v0 }
  0x7a   : > { %605 = vmatpush3.bf16.msra.mxu0 %v604_v25 }
  0x7d   : > { %580 = vmatmul.mubr.f32.vlgmr.msra.gmra.mrb[0].mxu0 %v277_v26 }
 0x150   : > { %v360_v28 = vpop.f32.mrb[0].mxu0 }
 0x151   : > { %v371_v30 = vmul.f32 %v524_v27, %v360_v28  ;;  %v581_v31 = vpop.f32.mrb[1].mxu0 }
 0x153   : > { %v379_v32 = vadd.f32 %v525_v29, %v371_v30 }
 0x155   : > { %380 = vst [vmem:[%s270_s22] sm:$0xff] %v379_v32 }
 0x156   : > { %755 = shalt.err (!%p752_p5)
}
 0x157   : > { %s756_s6 = scalar_lea.hbm %s1041_s13, 128  ;;  %s760_s25 = scalar_lea.hbm %s1094_s4, 256 }
 0x158   : > { %p757_p9 = scmp.ne.s32.totalorder %s1041_s13, %s756_s6  ;;  %p761_p7 = scmp.lt.u32.totalorder %s1041_s13, %s1094_s4 }
 0x159   : > { %p762_p3 = scmp.lt.u32.totalorder %s760_s25, %s756_s6  ;;  %p764_p4 = scmp.lt.u32.totalorder %s756_s6, %s1041_s13 }
 0x15a   : > { %p758_p1 = pnand %p757_p9, %p959_p10 }
 0x15b   : > { %p763_p13 = por %p762_p3, %p761_p7 }
 0x15c   : > { %p759_p2 = pneg %p758_p1 }
 0x15d   : > { %p765_p6 = por %p764_p4, %p763_p13 }
 0x15f   : > { %p766_p8 = pnand %p765_p6, %p759_p2 }
 0x161   : > { %769 = shalt.err (!%p766_p8)
}
 0x162   : > { %612 = dma.vmem_to_hbm [thread:$0]  (%p959_p10), %s1043_s28, 128, %s1041_s13, %s382_s24  }
 0x163 PF: > { %s408_s21 = sand.u32 1, %s808_s15   ;;  %p1112_p12 = scmp.ne.s32.totalorder %s1102_s26, 0 }
 0x164   : > { %p1113_p11 = scmp.ge.s32.totalorder %s828_s20, 2  ;;  %s409_s22 = scalar_lea.sflag [#allocation4], %s408_s21 }
 0x166   : > { %p623_p0 = pnand %p1113_p11, %p1112_p12 }
 0x168   : > { %803 = dma.done.wait (!%p623_p0), %s409_s22, 128  }
 0x169   : > { %805 = vsyncadd (!%p623_p0), %s409_s22, 4294967168  ;;  %s21_s20 = sadd.s32 1, %s828_s20   ;;  %s1114_s15 = smov %s812_s16 }
 0x16a   : > { %p18_p5 = scmp.ge.s32.totalorder %s21_s20, 4   ;;  %s1115_s16 = smov %s816_s17 }
 0x16b   : > { %s1116_s17 = smov %s968_s10  ;;  %s1117_s18 = smov %s824_s19 }
 0x16c   : > { %s1118_s19 = smov %s1120_s5  ;;  %20 = sbr.rel (!%p18_p5) target bundleno = 7 (0x7), region = 92 }
 0x173   :  { %414 = vsyncpa [#allocation3], 1 }
 0x174   :  { %416 = vsyncpa [#allocation3 + $0x1], 1 }
 0x175   :  { %417 = vsyncpa [#allocation6], 1 }
 0x176   :  { %418 = vsyncpa [#allocation4], 1 }
 0x177   :  { %420 = vsyncpa [#allocation4 + $0x1], 1 }

</bundles_post_ra>
